<compile_context>
chip_gen: v5e
topology: v5e:2x2
jax: 0.10.0
libtpu: 0.0.40
codegen_flags: <defaults>
</compile_context>

<pallas_src>
import functools

import jax
import jax.numpy as jnp
from jax.experimental import pallas as pl
from jax.experimental.pallas import tpu as pltpu


# ---------------------------------------------------------------------------
# Helpers
# ---------------------------------------------------------------------------
def _vmem_capacity_bytes():
    """Per-generation VMEM capacity (v5e/v6e: 128 MiB, v7x: 64 MiB)."""
    try:
        return int(pltpu.get_tpu_info().vmem_capacity_bytes)
    except Exception:
        return 64 << 20  # conservative default, safe on all generations


# ---------------------------------------------------------------------------
# Fused single-pass kernel: whole (1, C, HW) slab resident in VMEM.
# ---------------------------------------------------------------------------
def _fused_kernel(hw, c, eps, x_ref, gamma_ref, beta_ref, rho_ref, o_ref):
    f32 = jnp.float32
    x = x_ref[...].astype(f32)                           # (1, C, HW)
    n_in = float(hw)
    n_ln = float(c * hw)

    # Instance-norm stats (centered, numerically safe).
    in_sum = jnp.sum(x, axis=2, keepdims=True)           # (1, C, 1)
    in_mean = in_sum / n_in
    d = x - in_mean
    in_ss = jnp.sum(d * d, axis=2, keepdims=True)        # (1, C, 1)
    in_var = in_ss / (n_in - 1.0)                        # unbiased (torch.var)
    inv_in = jax.lax.rsqrt(in_var + eps)

    # Layer-norm stats derived exactly from IN stats (Chan merge).
    ln_mean = jnp.sum(in_sum, axis=1, keepdims=True) / n_ln          # (1, 1, 1)
    dm = in_mean - ln_mean
    ln_ss = jnp.sum(in_ss + n_in * (dm * dm), axis=1, keepdims=True)  # (1, 1, 1)
    ln_var = ln_ss / (n_ln - 1.0)
    inv_ln = jax.lax.rsqrt(ln_var + eps)

    # rho softmax over the last (size-2) axis, done in-kernel (tiny).
    r = rho_ref[...].astype(f32)                         # (1, C, 2)
    r = r - jnp.max(r, axis=2, keepdims=True)
    e = jnp.exp(r)
    p = e / jnp.sum(e, axis=2, keepdims=True)
    rho0 = p[:, :, 0:1]                                  # (1, C, 1)
    rho1 = p[:, :, 1:2]                                  # (1, C, 1)

    g = gamma_ref[...].astype(f32)                       # (1, C, 1)
    bt = beta_ref[...].astype(f32)                       # (1, C, 1)

    scale = g * (rho0 * inv_in + rho1 * inv_ln)
    bias = bt - g * (rho0 * in_mean * inv_in + rho1 * ln_mean * inv_ln)
    o_ref[...] = (x * scale + bias).astype(o_ref.dtype)


def _ada_iln_fused(x_flat, gamma3, beta3, rho, eps, vmem_limit):
    B, C, HW = x_flat.shape
    kern = functools.partial(_fused_kernel, HW, C, float(eps))
    return pl.pallas_call(
        kern,
        out_shape=jax.ShapeDtypeStruct((B, C, HW), x_flat.dtype),
        grid_spec=pltpu.PrefetchScalarGridSpec(
            num_scalar_prefetch=0,
            grid=(B,),
            in_specs=[
                pl.BlockSpec((1, C, HW), lambda b: (b, 0, 0)),
                pl.BlockSpec((1, C, 1), lambda b: (b, 0, 0)),
                pl.BlockSpec((1, C, 1), lambda b: (b, 0, 0)),
                pl.BlockSpec((1, C, 2), lambda b: (0, 0, 0)),
            ],
            out_specs=pl.BlockSpec((1, C, HW), lambda b: (b, 0, 0)),
        ),
        compiler_params=pltpu.CompilerParams(
            dimension_semantics=("parallel",),
            vmem_limit_bytes=int(vmem_limit)),
    )(x_flat, gamma3, beta3, rho)


# ---------------------------------------------------------------------------
# Fallback pass 1: lane-dense per-(batch, channel) sum and sum-of-squares.
# Accumulators stay (1, C, 128) -- pure VPU lane-wise adds each step; the
# single cross-lane reduce happens once in the glue.
# ---------------------------------------------------------------------------
def _stats_kernel(x_ref, sum_ref, sumsq_ref):
    h = pl.program_id(1)

    @pl.when(h == 0)
    def _():
        sum_ref[...] = jnp.zeros_like(sum_ref)
        sumsq_ref[...] = jnp.zeros_like(sumsq_ref)

    x = x_ref[...].astype(jnp.float32)                   # (1, C, thw)
    thw = x.shape[2]
    s = sum_ref[...]                                     # (1, C, 128)
    ss = sumsq_ref[...]                                  # (1, C, 128)
    for j in range(thw // 128):                          # static unroll (<= 64)
        xs = x[:, :, j * 128:(j + 1) * 128]
        s = s + xs
        ss = ss + xs * xs
    sum_ref[...] = s
    sumsq_ref[...] = ss


# ---------------------------------------------------------------------------
# Fallback pass 2: fused affine apply  o = x * A_c + B_c.
# ---------------------------------------------------------------------------
def _apply_kernel(x_ref, ab_ref, o_ref):
    x = x_ref[...].astype(jnp.float32)                   # (1, C, thw)
    ab = ab_ref[...].astype(jnp.float32)                 # (1, C, 2) [scale|bias]
    a = ab[:, :, 0:1]
    b = ab[:, :, 1:2]
    o_ref[...] = (x * a + b).astype(o_ref.dtype)


def _ada_iln_two_pass(x_flat, gamma, beta, rho, eps, capacity):
    B, C, HW = x_flat.shape
    in_bytes = x_flat.dtype.itemsize

    # Tile the spatial axis: multiple of 128 lanes, <= 4 MiB (f32) per block,
    # <= 8192 lanes (bounds the static unroll in the stats kernel).
    cap_block_f32 = 4 << 20
    cap_lane = max(128, (cap_block_f32 // (C * 4)) // 128 * 128)
    hw128 = ((HW + 127) // 128) * 128
    thw = min(8192, cap_lane, hw128)
    HWp = ((HW + thw - 1) // thw) * thw
    n_hw = HWp // thw
    if HWp != HW:
        # Zero padding is harmless to sum / sum-of-squares; the true HW is
        # kept in the denominators below and the tail is sliced off the output.
        x_flat = jnp.pad(x_flat, ((0, 0), (0, 0), (0, HWp - HW)))

    blk_in = C * thw * in_bytes
    blk_f32 = C * thw * 4
    limit1 = min(int(0.9 * capacity), 2 * blk_in + 3 * blk_f32 + (4 << 20))
    limit2 = min(int(0.9 * capacity), 4 * blk_in + 3 * blk_f32 + (4 << 20))

    # ---- Pass 1: per-channel partial sums (single pass over x) ------------
    ch_sum128, ch_sumsq128 = pl.pallas_call(
        _stats_kernel,
        out_shape=(jax.ShapeDtypeStruct((B, C, 128), jnp.float32),
                   jax.ShapeDtypeStruct((B, C, 128), jnp.float32)),
        grid_spec=pltpu.PrefetchScalarGridSpec(
            num_scalar_prefetch=0,
            grid=(B, n_hw),
            in_specs=[pl.BlockSpec((1, C, thw), lambda b, h: (b, 0, h))],
            out_specs=(pl.BlockSpec((1, C, 128), lambda b, h: (b, 0, 0)),
                       pl.BlockSpec((1, C, 128), lambda b, h: (b, 0, 0))),
        ),
        compiler_params=pltpu.CompilerParams(
            dimension_semantics=("parallel", "arbitrary"),
            vmem_limit_bytes=limit1),
    )(x_flat)

    # ---- Tiny O(B*C) coefficient math (glue, not the hot path) ------------
    f32 = jnp.float32
    s = jnp.sum(ch_sum128, axis=2).astype(f32)           # (B, C)
    ss = jnp.sum(ch_sumsq128, axis=2).astype(f32)        # (B, C)
    n_in = float(HW)
    n_ln = float(C * HW)

    in_mean = s / n_in
    in_var = jnp.maximum((ss - n_in * in_mean * in_mean) / (n_in - 1.0), 0.0)
    inv_in = jax.lax.rsqrt(in_var + eps)

    tot_s = jnp.sum(s, axis=1, keepdims=True)            # (B, 1)
    tot_ss = jnp.sum(ss, axis=1, keepdims=True)          # (B, 1)
    ln_mean = tot_s / n_ln
    ln_var = jnp.maximum((tot_ss - n_ln * ln_mean * ln_mean) / (n_ln - 1.0), 0.0)
    inv_ln = jax.lax.rsqrt(ln_var + eps)

    rho_sm = jax.nn.softmax(rho.astype(f32), axis=2)     # (1, C, 2)
    rho0 = rho_sm[:, :, 0]
    rho1 = rho_sm[:, :, 1]

    g = gamma.astype(f32)
    bt = beta.astype(f32)
    scale = g * (rho0 * inv_in + rho1 * inv_ln)
    bias = bt - g * (rho0 * in_mean * inv_in + rho1 * ln_mean * inv_ln)
    ab = jnp.stack([scale, bias], axis=-1)               # (B, C, 2)

    # ---- Pass 2: fused FMA apply (lane-dense output, fully parallel) ------
    out_flat = pl.pallas_call(
        _apply_kernel,
        out_shape=jax.ShapeDtypeStruct((B, C, HWp), x_flat.dtype),
        grid_spec=pltpu.PrefetchScalarGridSpec(
            num_scalar_prefetch=0,
            grid=(B, n_hw),
            in_specs=[pl.BlockSpec((1, C, thw), lambda b, h: (b, 0, h)),
                      pl.BlockSpec((1, C, 2), lambda b, h: (b, 0, 0))],
            out_specs=pl.BlockSpec((1, C, thw), lambda b, h: (b, 0, h)),
        ),
        compiler_params=pltpu.CompilerParams(
            dimension_semantics=("parallel", "parallel"),
            vmem_limit_bytes=limit2),
    )(x_flat, ab)

    if HWp != HW:
        out_flat = out_flat[:, :, :HW]
    return out_flat


# ---------------------------------------------------------------------------
# Public entry point
# ---------------------------------------------------------------------------
def ada_iln_forward(x, gamma, beta, rho, eps=1e-5, force_two_pass=False):
    """x: (B, C, H, W) NCHW; gamma, beta: (B, C); rho: (1, C, 2) raw parameter."""
    B, C, H, W = x.shape
    HW = H * W
    x_flat = x.reshape(B, C, HW)

    capacity = _vmem_capacity_bytes()

    # Conservative per-generation gate for the VMEM-resident fused path:
    # double-buffered in/out blocks + f32 in-kernel temporaries.
    slab_io = C * HW * x.dtype.itemsize
    slab_f32 = C * HW * 4
    fused_need = 4 * slab_io + 3 * slab_f32 + (2 << 20)
    fused_ok = (not force_two_pass) and fused_need <= int(0.75 * capacity)

    if fused_ok:
        vmem_limit = min(int(0.9 * capacity), fused_need + (8 << 20))
        out_flat = _ada_iln_fused(
            x_flat, gamma.reshape(B, C, 1), beta.reshape(B, C, 1), rho,
            eps, vmem_limit)
    else:
        out_flat = _ada_iln_two_pass(x_flat, gamma, beta, rho, eps, capacity)

    return out_flat.reshape(B, C, H, W)


def ada_iln_reference(x, gamma, beta, rho, eps=1e-5):
    """Pure-JAX reference matching the PyTorch forward (unbiased variance)."""
    x = x.astype(jnp.float32)
    B, C, H, W = x.shape
    in_mean = jnp.mean(x, axis=(2, 3), keepdims=True)
    in_var = jnp.sum((x - in_mean) ** 2, axis=(2, 3), keepdims=True) / (H * W - 1)
    out_in = (x - in_mean) / jnp.sqrt(in_var + eps)
    ln_mean = jnp.mean(x, axis=(1, 2, 3), keepdims=True)
    ln_var = jnp.sum((x - ln_mean) ** 2, axis=(1, 2, 3), keepdims=True) / (C * H * W - 1)
    out_ln = (x - ln_mean) / jnp.sqrt(ln_var + eps)
    rho_sm = jax.nn.softmax(rho.astype(jnp.float32), axis=2)
    rho0 = rho_sm[:, :, 0].reshape(1, C, 1, 1)
    rho1 = rho_sm[:, :, 1].reshape(1, C, 1, 1)
    out = rho0 * out_in + rho1 * out_ln
    return out * gamma[:, :, None, None] + beta[:, :, None, None]


if __name__ == "__main__":
    B, C, H, W = 2, 4, 16, 16
    num_features = C

    # Deterministic parameter init, matching adaILN.__init__ (using_bn=False):
    # rho shape (1, C, 2), rho[:,:,0] = 3.2, rho[:,:,1] = 1.0
    rho = jnp.concatenate(
        [jnp.full((1, num_features, 1), 3.2, dtype=jnp.float32),
         jnp.full((1, num_features, 1), 1.0, dtype=jnp.float32)],
        axis=2,
    )

    key = jax.random.PRNGKey(0)
    kx, kg, kb, kx2, kg2, kb2 = jax.random.split(key, 6)
    x = jax.random.normal(kx, (B, C, H, W), dtype=jnp.float32)
    gamma = jax.random.normal(kg, (B, C), dtype=jnp.float32)
    beta = jax.random.normal(kb, (B, C), dtype=jnp.float32)

    ref = ada_iln_reference(x, gamma, beta, rho)

    # 1) Fused single-pass path.
    out_fused = jax.block_until_ready(ada_iln_forward(x, gamma, beta, rho))
    assert out_fused.shape == (B, C, H, W)
    assert jnp.allclose(out_fused, ref, atol=1e-4, rtol=1e-4), "fused mismatch"

    # 2) Two-pass fallback path (forced) on the same inputs.
    out_2p = jax.block_until_ready(
        ada_iln_forward(x, gamma, beta, rho, force_two_pass=True))
    assert jnp.allclose(out_2p, ref, atol=1e-4, rtol=1e-4), "two-pass mismatch"

    # 3) Two-pass fallback with a non-128-multiple spatial size (padding path).
    B2, C2, H2, W2 = 1, 8, 10, 10
    rho2 = jnp.concatenate(
        [jnp.full((1, C2, 1), 3.2, dtype=jnp.float32),
         jnp.full((1, C2, 1), 1.0, dtype=jnp.float32)], axis=2)
    x2 = jax.random.normal(kx2, (B2, C2, H2, W2), dtype=jnp.float32)
    gamma2 = jax.random.normal(kg2, (B2, C2), dtype=jnp.float32)
    beta2 = jax.random.normal(kb2, (B2, C2), dtype=jnp.float32)
    ref2 = ada_iln_reference(x2, gamma2, beta2, rho2)
    out2 = jax.block_until_ready(
        ada_iln_forward(x2, gamma2, beta2, rho2, force_two_pass=True))
    assert out2.shape == (B2, C2, H2, W2)
    assert jnp.allclose(out2, ref2, atol=1e-4, rtol=1e-4), "padded mismatch"

    print("KERNEL_OK")
</pallas_src>

<mosaic_0001>
module attributes {stable_mosaic.version = 11 : i64} {
  func.func @_fused_kernel(%arg0: i32, %arg1: memref<1x4x256xf32, #tpu.memory_space<vmem>>, %arg2: memref<1x4x1xf32, #tpu.memory_space<vmem>>, %arg3: memref<1x4x1xf32, #tpu.memory_space<vmem>>, %arg4: memref<1x4x2xf32, #tpu.memory_space<vmem>>, %arg5: memref<1x4x256xf32, #tpu.memory_space<vmem>>) attributes {dimension_semantics = [#tpu.dimension_semantics<parallel>], iteration_bounds = array<i64: 2>, scalar_prefetch = 0 : i64, scratch_operands = 0 : i64, tpu.core_type = #tpu.core_type<tc>, window_params = [{transform_indices = @transform_0, window_bounds = array<i64: 1, 4, 256>}, {transform_indices = @transform_1, window_bounds = array<i64: 1, 4, 1>}, {transform_indices = @transform_2, window_bounds = array<i64: 1, 4, 1>}, {pipeline_mode = #tpu.pipeline_mode<synchronous>, transform_indices = @transform_3, window_bounds = array<i64: 1, 4, 2>}, {transform_indices = @transform_4, window_bounds = array<i64: 1, 4, 256>}]} {
    %c0 = arith.constant 0 : index
    %c0_0 = arith.constant 0 : index
    %c0_1 = arith.constant 0 : index
    %0 = vector.load %arg1[%c0, %c0_0, %c0_1] : memref<1x4x256xf32, #tpu.memory_space<vmem>>, vector<1x4x256xf32>
    %cst = arith.constant dense<0.000000e+00> : vector<1x4xf32>
    %1 = vector.multi_reduction <add>, %0, %cst [2] : vector<1x4x256xf32> to vector<1x4xf32>
    %2 = vector.shape_cast %1 : vector<1x4xf32> to vector<1x4x1xf32>
    %cst_2 = arith.constant 2.560000e+02 : f32
    %3 = vector.broadcast %cst_2 : f32 to vector<1x4x1xf32>
    %4 = arith.divf %2, %3 : vector<1x4x1xf32>
    %5 = vector.broadcast %4 : vector<1x4x1xf32> to vector<1x4x256xf32>
    %6 = arith.subf %0, %5 : vector<1x4x256xf32>
    %7 = arith.mulf %6, %6 : vector<1x4x256xf32>
    %cst_3 = arith.constant dense<0.000000e+00> : vector<1x4xf32>
    %8 = vector.multi_reduction <add>, %7, %cst_3 [2] : vector<1x4x256xf32> to vector<1x4xf32>
    %9 = vector.shape_cast %8 : vector<1x4xf32> to vector<1x4x1xf32>
    %cst_4 = arith.constant 2.550000e+02 : f32
    %10 = vector.broadcast %cst_4 : f32 to vector<1x4x1xf32>
    %11 = arith.divf %9, %10 : vector<1x4x1xf32>
    %cst_5 = arith.constant 9.99999974E-6 : f32
    %12 = vector.broadcast %cst_5 : f32 to vector<1x4x1xf32>
    %13 = arith.addf %11, %12 : vector<1x4x1xf32>
    %14 = math.rsqrt %13 : vector<1x4x1xf32>
    %cst_6 = arith.constant dense<0.000000e+00> : vector<1x1xf32>
    %15 = vector.multi_reduction <add>, %2, %cst_6 [1] : vector<1x4x1xf32> to vector<1x1xf32>
    %16 = vector.shape_cast %15 : vector<1x1xf32> to vector<1x1x1xf32>
    %cst_7 = arith.constant 1.024000e+03 : f32
    %17 = vector.broadcast %cst_7 : f32 to vector<1x1x1xf32>
    %18 = arith.divf %16, %17 : vector<1x1x1xf32>
    %19 = vector.broadcast %18 : vector<1x1x1xf32> to vector<1x4x1xf32>
    %20 = arith.subf %4, %19 : vector<1x4x1xf32>
    %21 = arith.mulf %20, %20 : vector<1x4x1xf32>
    %cst_8 = arith.constant 2.560000e+02 : f32
    %22 = vector.broadcast %cst_8 : f32 to vector<1x4x1xf32>
    %23 = arith.mulf %22, %21 : vector<1x4x1xf32>
    %24 = arith.addf %9, %23 : vector<1x4x1xf32>
    %cst_9 = arith.constant dense<0.000000e+00> : vector<1x1xf32>
    %25 = vector.multi_reduction <add>, %24, %cst_9 [1] : vector<1x4x1xf32> to vector<1x1xf32>
    %26 = vector.shape_cast %25 : vector<1x1xf32> to vector<1x1x1xf32>
    %cst_10 = arith.constant 1.023000e+03 : f32
    %27 = vector.broadcast %cst_10 : f32 to vector<1x1x1xf32>
    %28 = arith.divf %26, %27 : vector<1x1x1xf32>
    %cst_11 = arith.constant 9.99999974E-6 : f32
    %29 = vector.broadcast %cst_11 : f32 to vector<1x1x1xf32>
    %30 = arith.addf %28, %29 : vector<1x1x1xf32>
    %31 = math.rsqrt %30 : vector<1x1x1xf32>
    %c0_12 = arith.constant 0 : index
    %c0_13 = arith.constant 0 : index
    %c0_14 = arith.constant 0 : index
    %32 = vector.load %arg4[%c0_12, %c0_13, %c0_14] : memref<1x4x2xf32, #tpu.memory_space<vmem>>, vector<1x4x2xf32>
    %cst_15 = arith.constant dense<0xFF800000> : vector<1x4xf32>
    %33 = vector.multi_reduction <maximumf>, %32, %cst_15 [2] : vector<1x4x2xf32> to vector<1x4xf32>
    %34 = vector.shape_cast %33 : vector<1x4xf32> to vector<1x4x1xf32>
    %35 = vector.broadcast %34 : vector<1x4x1xf32> to vector<1x4x2xf32>
    %36 = arith.subf %32, %35 : vector<1x4x2xf32>
    %37 = math.exp %36 : vector<1x4x2xf32>
    %cst_16 = arith.constant dense<0.000000e+00> : vector<1x4xf32>
    %38 = vector.multi_reduction <add>, %37, %cst_16 [2] : vector<1x4x2xf32> to vector<1x4xf32>
    %39 = vector.shape_cast %38 : vector<1x4xf32> to vector<1x4x1xf32>
    %40 = vector.broadcast %39 : vector<1x4x1xf32> to vector<1x4x2xf32>
    %41 = arith.divf %37, %40 : vector<1x4x2xf32>
    %42 = vector.extract_strided_slice %41 {offsets = [0, 0, 0], sizes = [1, 4, 1], strides = [1, 1, 1]} : vector<1x4x2xf32> to vector<1x4x1xf32>
    %43 = vector.extract_strided_slice %41 {offsets = [0, 0, 1], sizes = [1, 4, 1], strides = [1, 1, 1]} : vector<1x4x2xf32> to vector<1x4x1xf32>
    %c0_17 = arith.constant 0 : index
    %c0_18 = arith.constant 0 : index
    %c0_19 = arith.constant 0 : index
    %44 = vector.load %arg2[%c0_17, %c0_18, %c0_19] : memref<1x4x1xf32, #tpu.memory_space<vmem>>, vector<1x4x1xf32>
    %c0_20 = arith.constant 0 : index
    %c0_21 = arith.constant 0 : index
    %c0_22 = arith.constant 0 : index
    %45 = vector.load %arg3[%c0_20, %c0_21, %c0_22] : memref<1x4x1xf32, #tpu.memory_space<vmem>>, vector<1x4x1xf32>
    %46 = arith.mulf %42, %14 : vector<1x4x1xf32>
    %47 = vector.broadcast %31 : vector<1x1x1xf32> to vector<1x4x1xf32>
    %48 = arith.mulf %43, %47 : vector<1x4x1xf32>
    %49 = arith.addf %46, %48 : vector<1x4x1xf32>
    %50 = arith.mulf %44, %49 : vector<1x4x1xf32>
    %51 = arith.mulf %42, %4 : vector<1x4x1xf32>
    %52 = arith.mulf %51, %14 : vector<1x4x1xf32>
    %53 = vector.broadcast %18 : vector<1x1x1xf32> to vector<1x4x1xf32>
    %54 = arith.mulf %43, %53 : vector<1x4x1xf32>
    %55 = vector.broadcast %31 : vector<1x1x1xf32> to vector<1x4x1xf32>
    %56 = arith.mulf %54, %55 : vector<1x4x1xf32>
    %57 = arith.addf %52, %56 : vector<1x4x1xf32>
    %58 = arith.mulf %44, %57 : vector<1x4x1xf32>
    %59 = arith.subf %45, %58 : vector<1x4x1xf32>
    %60 = vector.broadcast %50 : vector<1x4x1xf32> to vector<1x4x256xf32>
    %61 = arith.mulf %0, %60 : vector<1x4x256xf32>
    %62 = vector.broadcast %59 : vector<1x4x1xf32> to vector<1x4x256xf32>
    %63 = arith.addf %61, %62 : vector<1x4x256xf32>
    %c0_23 = arith.constant 0 : index
    %c0_24 = arith.constant 0 : index
    %c0_25 = arith.constant 0 : index
    %64 = vector.load %arg5[%c0_23, %c0_24, %c0_25] : memref<1x4x256xf32, #tpu.memory_space<vmem>>, vector<1x4x256xf32>
    tpu.vector_store %arg5[%c0_23, %c0_24, %c0_25], %63 {strides = array<i32>} : memref<1x4x256xf32, #tpu.memory_space<vmem>>, vector<1x4x256xf32>,
    return
  }
  func.func @transform_0(%arg0: i32) -> (i32, i32, i32) {
    %c0_i32 = arith.constant 0 : i32
    %c0_i32_0 = arith.constant 0 : i32
    %c0_i32_1 = arith.constant 0 : i32
    return %arg0, %c0_i32, %c0_i32_0 : i32, i32, i32
  }
  func.func @transform_1(%arg0: i32) -> (i32, i32, i32) {
    %c0_i32 = arith.constant 0 : i32
    %c0_i32_0 = arith.constant 0 : i32
    %c0_i32_1 = arith.constant 0 : i32
    return %arg0, %c0_i32, %c0_i32_0 : i32, i32, i32
  }
  func.func @transform_2(%arg0: i32) -> (i32, i32, i32) {
    %c0_i32 = arith.constant 0 : i32
    %c0_i32_0 = arith.constant 0 : i32
    %c0_i32_1 = arith.constant 0 : i32
    return %arg0, %c0_i32, %c0_i32_0 : i32, i32, i32
  }
  func.func @transform_3(%arg0: i32) -> (i32, i32, i32) {
    %c0_i32 = arith.constant 0 : i32
    %c0_i32_0 = arith.constant 0 : i32
    %c0_i32_1 = arith.constant 0 : i32
    %c0_i32_2 = arith.constant 0 : i32
    return %c0_i32, %c0_i32_0, %c0_i32_1 : i32, i32, i32
  }
  func.func @transform_4(%arg0: i32) -> (i32, i32, i32) {
    %c0_i32 = arith.constant 0 : i32
    %c0_i32_0 = arith.constant 0 : i32
    %c0_i32_1 = arith.constant 0 : i32
    return %arg0, %c0_i32, %c0_i32_0 : i32, i32, i32
  }
}

</mosaic_0001>

<bundles_post_ra>
// kernel: tpu_custom_call.1
= control target key start
LH: loop header
LB: loop body
LE: loop exit
PB: predicated region body
PF: predicated region fallthrough
CT: control target
= control target key end

     0   :  { %9 = vsyncpa [#allocation3], 0  ;;  %s807_s0 = inlined_call_operand.vmem [shape: f32[2,4,256], index: 0, kind: input, shape index: {}]   ;;  %s808_s1 = inlined_call_operand.vmem [shape: f32[2,4,1], index: 1, kind: input, shape index: {}]   ;;  %s809_s2 = inlined_call_operand.vmem [shape: f32[2,4,1], index: 2, kind: input, shape index: {}]   ;;  %s810_s3 = inlined_call_operand.vmem [shape: f32[1,4,2], index: 3, kind: input, shape index: {}]   ;;  %s811_s4 = inlined_call_operand.hbm [shape: f32[2,4,256], index: 4, kind: output, shape index: {}]  }
   0x1   :  { %11 = vsyncpa [#allocation3 + $0x1], 0  ;;  %s678_s15 = smov 0   ;;  %s680_s16 = smov 0  }
   0x2   :  { %s682_s17 = smov 0   ;;  %s684_s18 = smov 0  }
   0x3 LB: > { %s699_s19 = sadd.s32 4294967295, %s644_s18   ;;  %s502_s20 = sadd.s32 4294967294, %s644_s18   ;;  %s644_s18 = sphi %s684_s18, %s817_s18   ;;  %s640_s17 = sphi %s682_s17, %s816_s17   ;;  %s636_s16 = sphi %s680_s16, %s815_s16   ;;  %s632_s15 = sphi %s678_s15, %s814_s15  }
   0x4   : > { %s703_s21 = sadd.s32 1, %s644_s18   ;;  %s123_s22 = sadd.s32 1, %s640_s17 }
   0x5   : > { %s120_s23 = ssub.s32 %s644_s18, %s703_s21  ;;  %p133_p0 = scmp.ne.s32.totalorder %s640_s17, %s636_s16 }
   0x6   : > { %p121_p1 = scmp.eq.s32.totalorder %s120_s23, 0  ;;  %p134_p2 = scmp.eq.s32.totalorder %s699_s19, 1 }
   0x7   : > { %p139_p3 = scmp.ne.s32.totalorder %s636_s16, %s632_s15  ;;  %p140_p4 = scmp.eq.s32.totalorder %s502_s20, 1 }
   0x8   : > { %s714_s24 = scalar_select %p121_p1, %s640_s17, %s123_s22  }
   0x9   : > { %p716_p5 = por %p134_p2, %p133_p0  ;;  %p720_p6 = por %p140_p4, %p139_p3 }
   0xa   : > { %p505_p7 = scmp.ge.s32.totalorder %s644_s18, 1  ;;  %p183_p8 = scmp.lt.s32.totalorder %s644_s18, 3 }
   0xc   : > { %p184_p9 = pnand %p505_p7, %p183_p8 }
   0xd   : > { %p217_p10 = scmp.lt.s32.totalorder (!%p184_p9), %s699_s19, 1  ;;  %s651_s8 = smov (!%p184_p9), 127  }
   0xe   : > { %187 = sbr.rel (%p184_p9) target bundleno = 552 (0x228), region = 36  ;;  %s214_s22 = sand.u32 (!%p184_p9), 1, %s636_s16  }
   0xf   : > { %s506_s23 = sshll.u32 (!%p184_p9), %s214_s22, 3 }
  0x13   : > { %s728_s27 = scalar_select %p217_p10, %s699_s19, 1  ;;  %vm237_vm0 = vcmask 1043456   ;;  %v334_v6 = vld [vmem:[%s810_s3] sm:$0xf]  ;;  %vm335_vm1 = vcmask 11264   ;;  %v646_v8 = vmov 256.0  }
  0x14   : > { %v336_v7 = vsel %vm335_vm1, %v334_v6, -inf  ;;  %566 = vrcp.f32 %v646_v8  ;;  %v647_v14 = vmov 839922192   ;;  %v648_v33 = vmov 1024.0  }
  0x15   : > { %s516_s28 = sshll.u32 %s728_s27, 3  ;;  %v253_v15 = vunpack.c.l.s4 %v647_v14  ;;  %v649_v41 = vmov 255.0   ;;  %v650_v52 = vmov 1023.0   ;;  %s509_s9 = sshll.u32 %s728_s27, 2 }
  0x16   : > { %s221_s5 = scalar_lea.vmem %s807_s0, %s516_s28  ;;  %s225_s12 = scalar_lea.vmem %s808_s1, %s509_s9 }
  0x17   : > { %v734_v0 = vld [vmem:[%s221_s5] sm:$0xff]  ;;  %v743_v17 = vunpack.c.0.s8 %v253_v15  ;;  %s229_s20 = scalar_lea.vmem %s809_s2, %s509_s9  ;;  %s517_s27 = sshll.u32 %s699_s19, 3 }
  0x18   : > { %232 = vst [vmem:[#allocation1] ss:$2 sm:$0xff] %v734_v0  ;;  %s414_s30 = scalar_lea.hbm %s811_s4, %s517_s27  ;;  %s216_s5 = scalar_lea.vmem [#allocation2], %s506_s23 }
  0x19   : > { %s416_s6 = sshll.u32 %s216_s5, 4  ;;  %s418_s7 = sshll.u32 %s414_s30, 4  ;;  %s417_s6 = int_to_ptr.vmem [resolvable:$true] %s416_s6  ;;  %s419_s7 = int_to_ptr.hbm [resolvable:$true] %s418_s7 }
  0x1a   : > { %v567_v9 = vpop.eup %566  ;;  %s403_s19 = scalar_lea.sflag [#allocation3], %s214_s22 }
  0x1b   : > { %v244_v10 = vmul.f32 256.0, %v567_v9  ;;  %vm248_vm2 = vweird.f32 %v567_v9 }
  0x1d   : > { %v245_v11 = vsub.f32 1.0, %v244_v10 }
  0x1f   : > { %v233_v1 = vld.sshfl [vmem:[#allocation1] sm:$0xff pattern:$0x75316420]  ;;  %v234_v2 = vld.sshfl [vmem:[#allocation1 + $0x8] sm:$0xff pattern:$0x75316420]  ;;  %v246_v12 = vmul.f32 %v567_v9, %v245_v11 }
  0x20   : > { %v238_v3 = vsel %vm237_vm0, %v233_v1, 0.0  ;;  %v239_v4 = vsel %vm237_vm0, %v234_v2, 0.0 }
  0x21   : > { %v240_v5 = vadd.f32 %v239_v4, %v238_v3  ;;  %v247_v13 = vadd.f32 %v567_v9, %v246_v12 }
  0x23   : > { %241 = vadd.xlane.f32.xlu0 %v240_v5  ;;  %v249_v16 = vsel %vm248_vm2, %v567_v9, %v247_v13 }
  0x2b   : > { %337 = vmax.xlane.f32.xlu0 %v336_v7 }
  0x96   : > { %v242_v18 = vpop.xlane.xlu0 %241 }
  0x97   : > { %v745_v19 = vmul.f32 %v249_v16, %v242_v18  ;;  %v289_v34 = vsel %vm237_vm0, %v242_v18, 0.0 }
  0x98   : > { %v290_v35 = vrot.slane %v289_v34, 4 }
  0x99   : > { %v255_v20 = vperm.slane %v745_v19, %v743_v17 }
  0x9a   : > { %v291_v37 = vadd.f32 %v290_v35, %v289_v34 }
  0x9b   : > { %v257_v21 = vsub.f32 %v734_v0, %v255_v20 }
  0x9c   : > { %v292_v39 = vrot.slane %v291_v37, 2 }
  0x9d   : > { %v258_v22 = vmul.f32 %v257_v21, %v257_v21 }
  0x9e   : > { %v338_v23 = vpop.xlane.xlu0 %337  ;;  %v293_v42 = vadd.f32 %v292_v39, %v291_v37 }
  0x9f   : > { %260 = vst [vmem:[#allocation1] ss:$2 sm:$0xff] %v258_v22  ;;  %v339_v24 = vsub.f32 %v334_v6, %v338_v23 }
  0xa0   : > { %v294_v45 = vrot.slane %v293_v42, 1 }
  0xa1   : > { %v340_v25 = vmul.f32 1.442695, %v339_v24 }
  0xa2   : > { %v295_v48 = vadd.f32 %v294_v45, %v293_v42 }
  0xa3   : > { %568 = vpow2.f32 %v340_v25 }
  0xa4   : > { %570 = vrcp.f32 %v648_v33 }
  0xa5   : > { %572 = vrcp.f32 %v649_v41 }
  0xa6   : > { %v261_v26 = vld.sshfl [vmem:[#allocation1] sm:$0xff pattern:$0x75316420]  ;;  %v262_v27 = vld.sshfl [vmem:[#allocation1 + $0x8] sm:$0xff pattern:$0x75316420]  ;;  %574 = vrcp.f32 %v650_v52 }
  0xa7   : > { %v265_v28 = vsel %vm237_vm0, %v261_v26, 0.0  ;;  %v266_v29 = vsel %vm237_vm0, %v262_v27, 0.0 }
  0xa8   : > { %v267_v30 = vadd.f32 %v266_v29, %v265_v28 }
  0xa9   : > { %v752_v31 = vpop.eup %568 }
  0xaa   : > { %268 = vadd.xlane.f32.xlu1 %v267_v30  ;;  %v342_v32 = vsel %vm335_vm1, %v752_v31, 0.0  ;;  %v571_v36 = vpop.eup %570 }
  0xab   : > { %v297_v38 = vmul.f32 1024.0, %v571_v36  ;;  %v573_v44 = vpop.eup %572  ;;  %vm301_vm3 = vweird.f32 %v571_v36 }
  0xac   : > { %v271_v47 = vmul.f32 255.0, %v573_v44  ;;  %v575_v55 = vpop.eup %574  ;;  %vm275_vm4 = vweird.f32 %v573_v44 }
  0xad   : > { %v298_v40 = vsub.f32 1.0, %v297_v38  ;;  %v316_v58 = vmul.f32 1023.0, %v575_v55  ;;  %vm320_vm5 = vweird.f32 %v575_v55 }
  0xae   : > { %v272_v50 = vsub.f32 1.0, %v271_v47 }
  0xaf   : > { %v299_v43 = vmul.f32 %v571_v36, %v298_v40  ;;  %v317_v1 = vsub.f32 1.0, %v316_v58 }
  0xb0   : > { %v273_v53 = vmul.f32 %v573_v44, %v272_v50 }
  0xb1   : > { %v300_v46 = vadd.f32 %v571_v36, %v299_v43  ;;  %v318_v5 = vmul.f32 %v575_v55, %v317_v1 }
  0xb2   : > { %343 = vadd.xlane.f32.xlu1 %v342_v32  ;;  %v274_v56 = vadd.f32 %v573_v44, %v273_v53 }
  0xb3   : > { %v302_v49 = vsel %vm301_vm3, %v571_v36, %v300_v46  ;;  %v319_v9 = vadd.f32 %v575_v55, %v318_v5 }
  0xb4   : > { %v757_v51 = vmul.f32 %v302_v49, %v295_v48  ;;  %v276_v59 = vsel %vm275_vm4, %v573_v44, %v274_v56  ;;  %v652_v49 = vmov 0  }
  0xb5   : > { %v321_v14 = vsel %vm320_vm5, %v575_v55, %v319_v9  ;;  %564 = vset.pattern.permute.xlu0 %v652_v49  ;;  %565 = vset.pattern.permute.xlu1 %v652_v49  ;;  %v361_v55 = vld [vmem:[%s229_s20] sm:$0xf] }
  0xb6   : > { %v304_v54 = vsub.f32 %v745_v19, %v757_v51 }
  0xb8   : > { %v305_v57 = vmul.f32 %v304_v54, %v304_v54 }
  0xba   : > { %v306_v60 = vmul.f32 256.0, %v305_v57 }
 0x11d   : > { %v269_v61 = vpop.xlane.xlu1 %268 }
 0x11e   : > { %v277_v62 = vmul.f32 %v276_v59, %v269_v61  ;;  %v307_v63 = vadd.f32 %v306_v60, %v269_v61 }
 0x120   : > { %v278_v2 = vadd.f32 1e-05, %v277_v62  ;;  %v308_v3 = vsel %vm237_vm0, %v307_v63, 0.0 }
 0x121   : > { %v309_v4 = vrot.slane %v308_v3, 4 }
 0x122   : > { %576 = vrsqrt.f32 %v278_v2  ;;  %vm285_vm11 = vweird.f32 %v278_v2 }
 0x123   : > { %v310_v6 = vadd.f32 %v309_v4, %v308_v3 }
 0x125   : > { %v311_v7 = vrot.slane %v310_v6, 2  ;;  %v344_v8 = vpop.xlane.xlu1 %343 }
 0x126   : > { %578 = vrcp.f32 %v344_v8  ;;  %vm350_vm6 = vweird.f32 %v344_v8  ;;  %v356_v26 = vand.u32 2147483648, %v344_v8  ;;  %v354_v28 = vand.u32 2147483647, %v344_v8 }
 0x127   : > { %v312_v10 = vadd.f32 %v311_v7, %v310_v6 }
 0x128   : > { %v577_v11 = vpop.eup %576  ;;  %v357_v30 = vor.u32 1.1754944e-38, %v356_v26  ;;  %vm355_vm10 = vcmp.eq.f32.partialorder %v354_v28, 8.507059e+37 }
 0x129   : > { %v280_v12 = vmul.f32 %v577_v11, %v278_v2  ;;  %v313_v13 = vrot.slane %v312_v10, 1  ;;  %vm286_vm9 = vweird.f32 %v577_v11 }
 0x12a   : > { %vm287_vm12 = vmor %vm285_vm11, %vm286_vm9 }
 0x12b   : > { %v281_v15 = vmul.f32 %v577_v11, %v280_v12  ;;  %v314_v16 = vadd.f32 %v313_v13, %v312_v10 }
 0x12c   : > { %v579_v18 = vpop.eup %578 }
 0x12d   : > { %v282_v20 = vmul.f32 0.5, %v281_v15  ;;  %v346_v21 = vmul.f32 %v579_v18, %v344_v8  ;;  %v322_v22 = vmul.f32 %v321_v14, %v314_v16  ;;  %vm351_vm7 = vweird.f32 %v579_v18 }
 0x12e   : > { %vm352_vm8 = vmor %vm350_vm6, %vm351_vm7 }
 0x12f   : > { %v347_v23 = vsub.f32 1.0, %v346_v21  ;;  %v323_v24 = vadd.f32 1e-05, %v322_v22  ;;  %v283_v25 = vsub.f32 1.5, %v282_v20 }
 0x131   : > { %v348_v27 = vmul.f32 %v579_v18, %v347_v23  ;;  %580 = vrsqrt.f32 %v323_v24  ;;  %v284_v32 = vmul.f32 %v577_v11, %v283_v25  ;;  %vm330_vm14 = vweird.f32 %v323_v24 }
 0x133   : > { %v349_v29 = vadd.f32 %v579_v18, %v348_v27  ;;  %v288_v38 = vsel %vm287_vm12, %v577_v11, %v284_v32 }
 0x135   : > { %v353_v33 = vsel %vm352_vm8, %v579_v18, %v349_v29 }
 0x136   : > { %v358_v34 = vsel %vm355_vm10, %v357_v30, %v353_v33 }
 0x137   : > { %v581_v35 = vpop.eup %580  ;;  %v359_v36 = vmul.f32 %v752_v31, %v358_v34 }
 0x138   : > { %v325_v37 = vmul.f32 %v581_v35, %v323_v24  ;;  %vm331_vm13 = vweird.f32 %v581_v35 }
 0x139   : > { %v362_v39 = vmul.f32 %v359_v36, %v288_v38  ;;  %v370_v40 = vmul.f32 %v359_v36, %v745_v19  ;;  %vm332_vm15 = vmor %vm330_vm14, %vm331_vm13  ;;  %v372_v31 = vmul.f32 %v359_v36, %v757_v51  ;;  %v360_v19 = vld [vmem:[%s225_s12] sm:$0xf]  ;;  %s602_s12 = scalar_lea.hbm %s811_s4, 16 }
 0x13a   : > { %v326_v41 = vmul.f32 %v581_v35, %v325_v37 }
 0x13b   : > { %v371_v42 = vmul.f32 %v370_v40, %v288_v38 }
 0x13c   : > { %v327_v43 = vmul.f32 0.5, %v326_v41 }
 0x13e   : > { %v328_v44 = vsub.f32 1.5, %v327_v43 }
 0x140   : > { %v329_v45 = vmul.f32 %v581_v35, %v328_v44 }
 0x142   : > { %v333_v46 = vsel %vm332_vm15, %v581_v35, %v329_v45 }
 0x143   : > { %v363_v47 = vmul.f32 %v359_v36, %v333_v46  ;;  %v373_v48 = vmul.f32 %v372_v31, %v333_v46 }
 0x145   : > { %365 = vrot.lane.b32.xlu2 %v363_v47, %s651_s8 }
 0x14d   : > { %375 = vrot.lane.b32.xlu2 %v373_v48, %s651_s8  ;;  %s596_s8 = sshra.s32 %s419_s7, 4  ;;  %s597_s8 = int_to_ptr.hbm [resolvable:$true] %s596_s8 }
 0x14e   : > { %s598_s9 = scalar_lea.hbm %s597_s8, 8  ;;  %p603_p0 = scmp.lt.s32.totalorder %s597_s8, %s811_s4 }
 0x14f   : > { %p599_p11 = scmp.ne.s32.totalorder %s597_s8, %s598_s9  ;;  %p604_p1 = scmp.lt.s32.totalorder %s602_s12, %s598_s9 }
 0x151   : > { %p600_p12 = pnand %p599_p11, %p716_p5  ;;  %p605_p2 = por %p604_p1, %p603_p0 }
 0x153   : > { %p601_p13 = pneg %p600_p12 }
 0x155   : > { %p606_p3 = pnand %p605_p2, %p601_p13 }
 0x19f   : > { %v366_v50 = vpop.permute.xlu2 %365 }
 0x1a0   : > { %v368_v52 = vadd.f32 %v366_v50, %v362_v39 }
 0x1a2   : > { %v369_v53 = vmul.f32 %v368_v52, %v360_v19 }
 0x1a4   : > { %383 = vperm.xlu0 %564, %v369_v53  }
 0x1a7   : > { %v376_v51 = vpop.permute.xlu2 %375 }
 0x1a8   : > { %v378_v54 = vadd.f32 %v376_v51, %v371_v42 }
 0x1aa   : > { %v379_v56 = vmul.f32 %v378_v54, %v360_v19 }
 0x1ac   : > { %v380_v57 = vsub.f32 %v361_v55, %v379_v56 }
 0x1ae   : > { %393 = vperm.xlu1 %565, %v380_v57  }
 0x216   : > { %v384_v58 = vpop.permute.xlu0 %383 }
 0x217   : > { %v388_v59 = vperm.slane %v384_v58, %v743_v17 }
 0x219   : > { %v390_v61 = vmul.f32 %v388_v59, %v734_v0 }
 0x220   : > { %v394_v60 = vpop.permute.xlu1 %393 }
 0x221   : > { %v398_v62 = vperm.slane %v394_v60, %v743_v17 }
 0x223   : > { %v400_v63 = vadd.f32 %v398_v62, %v390_v61 }
 0x225   : > { %401 = vst [vmem:[%s216_s5] sm:$0xff] %v400_v63 }
 0x226   : > { %609 = shalt.err (!%p606_p3)
}
 0x227   : > { %518 = dma.vmem_to_hbm [thread:$0]  (%p716_p5), %s417_s6, 128, %s419_s7, %s403_s19  }
 0x228 PF: > { %p524_p4 = scmp.ge.s32.totalorder %s644_s18, 2  ;;  %s430_s20 = sand.u32 1, %s632_s15  }
 0x229   : > { %s431_s22 = scalar_lea.sflag [#allocation3], %s430_s20 }
 0x22a   : > { %p521_p7 = pnand %p524_p4, %p720_p6 }
 0x22c   : > { %p522_p8 = pneg %p521_p7 }
 0x22e   : > { %627 = dma.done.wait (%p522_p8), %s431_s22, 128  }
 0x22f   : > { %629 = vsyncadd (%p522_p8), %s431_s22, 4294967168  ;;  %p14_p9 = scmp.ge.s32.totalorder %s703_s21, 4   ;;  %s814_s15 = smov %s636_s16 }
 0x230   : > { %s815_s16 = smov %s640_s17  ;;  %s816_s17 = smov %s714_s24 }
 0x231   : > { %s817_s18 = smov %s703_s21  ;;  %16 = sbr.rel (!%p14_p9) target bundleno = 3 (0x3), region = 77 }
 0x236   :  { %437 = vsyncpa [#allocation3], 1 }
 0x237   :  { %439 = vsyncpa [#allocation3 + $0x1], 1 }

</bundles_post_ra>
